<compile_context>
chip_gen: v7x
topology: tpu7x:2x2x1
jax: 0.10.0
libtpu: 0.0.40
codegen_flags: <defaults>
</compile_context>

<pallas_src>
import jax
import jax.numpy as jnp
from jax.experimental import pallas as pl
from jax.experimental.pallas import tpu as pltpu


def _classifier_kernel(x_ref, w1_ref, b1_ref, w2_ref, b2_ref, o_ref):
    # Cast the f32 activation tile to bf16 in-kernel (VPU) for the MXU.
    x = x_ref[...].astype(w1_ref.dtype)                    # (TB, 256) bf16
    # fc1: bf16 MXU matmul, f32 accumulation; bias + ReLU in f32.
    h = jnp.dot(x, w1_ref[...], preferred_element_type=jnp.float32)
    h = jnp.maximum(h + b1_ref[...], 0.0)                  # (TB, 128) f32
    # fc2: cast activations back to bf16 for the MXU, accumulate in f32.
    z = jnp.dot(h.astype(w2_ref.dtype), w2_ref[...],
                preferred_element_type=jnp.float32)
    z = z + b2_ref[...]                                    # (TB, 256) f32
    o_ref[...] = jax.nn.sigmoid(z).astype(o_ref.dtype)     # exp on EUP


def _round_up(n, m):
    return ((n + m - 1) // m) * m


def prepare_classifier_params(w1, b1, w2, b2):
    """One-time weight prep: pad hidden 64->128, cast weights to bf16.

    w1: (input_dim, hidden)  b1: (hidden,)
    w2: (hidden, output_dim) b2: (output_dim,)
    """
    input_dim, hidden = w1.shape
    output_dim = w2.shape[1]
    hidden_p = _round_up(hidden, 128)
    cdt = jnp.bfloat16

    w1_p = jnp.zeros((input_dim, hidden_p), cdt).at[:, :hidden].set(w1.astype(cdt))
    b1_p = jnp.zeros((1, hidden_p), jnp.float32).at[0, :hidden].set(b1.astype(jnp.float32))
    w2_p = jnp.zeros((hidden_p, output_dim), cdt).at[:hidden, :].set(w2.astype(cdt))
    b2_p = b2.astype(jnp.float32).reshape(1, output_dim)
    return w1_p, b1_p, w2_p, b2_p


def _choose_tile(batch, block_batch):
    # Batch tile: multiple of 16 (bf16 sublane pack; also satisfies the f32
    # (8,128) constraint), capped at 8192 rows, never larger than the
    # 16-padded batch, and capped so large batches yield >= 2 grid tiles
    # (v7x megacore sharding via dimension_semantics=("parallel",)).
    tb = min(int(block_batch), 8192, _round_up(batch, 16))
    tb = max(16, (tb // 16) * 16)
    if batch > 2 * 16:
        tb = min(tb, max(16, _round_up((batch + 1) // 2, 16)))
    return tb


def classifier_forward(x, prepared_params, *, block_batch=4096):
    """Forward pass of Classifier.

    x : (B, input_dim) float32
    prepared_params: output of prepare_classifier_params
    returns (B, output_dim) float32
    """
    w1_p, b1_p, w2_p, b2_p = prepared_params
    B, input_dim = x.shape
    hidden_p = w1_p.shape[1]
    output_dim = w2_p.shape[1]

    TB = _choose_tile(B, block_batch)
    # Pad batch only to a sublane multiple (<= 15 extra rows); the ragged last
    # grid block (if B_pad % TB != 0) is handled by Pallas masking.
    B_pad = _round_up(B, 16)
    x_p = jnp.pad(x, ((0, B_pad - B), (0, 0))) if B_pad != B else x

    grid = (pl.cdiv(B_pad, TB),)

    # Double-buffered f32 x/out tiles + f32 intermediates + 0.26 MiB weights.
    vmem_limit = int(min(max(10 * TB * 1024 + (2 << 20), 4 << 20), 56 << 20))

    out_padded = pl.pallas_call(
        _classifier_kernel,
        out_shape=jax.ShapeDtypeStruct((B_pad, output_dim), jnp.float32),
        grid=grid,
        in_specs=[
            # Activations: tiled along the batch, double-buffered by Pallas.
            pl.BlockSpec((TB, input_dim), lambda i: (i, 0)),
            # Weights/biases: constant index_map -> VMEM-resident across tiles.
            pl.BlockSpec((input_dim, hidden_p), lambda i: (0, 0)),
            pl.BlockSpec((1, hidden_p), lambda i: (0, 0)),
            pl.BlockSpec((hidden_p, output_dim), lambda i: (0, 0)),
            pl.BlockSpec((1, output_dim), lambda i: (0, 0)),
        ],
        out_specs=pl.BlockSpec((TB, output_dim), lambda i: (i, 0)),
        compiler_params=pltpu.CompilerParams(
            dimension_semantics=("parallel",),   # megacore sharding on v7x
            vmem_limit_bytes=vmem_limit,         # unlock big tiles on v5e
        ),
    )(x_p, w1_p, b1_p, w2_p, b2_p)

    return out_padded[:B, :]


def _ref_matched(x, w1, b1, w2, b2):
    """Reference mirroring the kernel's bf16-operand / f32-accum math."""
    xb = x.astype(jnp.bfloat16)
    w1b = w1.astype(jnp.bfloat16)
    w2b = w2.astype(jnp.bfloat16)
    h = jnp.dot(xb, w1b, preferred_element_type=jnp.float32)
    h = jnp.maximum(h + b1.astype(jnp.float32), 0.0)
    z = jnp.dot(h.astype(jnp.bfloat16), w2b, preferred_element_type=jnp.float32)
    return jax.nn.sigmoid(z + b2.astype(jnp.float32))


def _ref_f32(x, w1, b1, w2, b2):
    """Pure-f32 reference (semantics of the PyTorch module)."""
    h = jnp.maximum(x @ w1 + b1, 0.0)
    return jax.nn.sigmoid(h @ w2 + b2)


if __name__ == "__main__":
    input_dim, hidden, output_dim = 256, 64, 256

    key = jax.random.PRNGKey(0)
    kx, k1, k2, k3, k4 = jax.random.split(key, 5)

    # Deterministic synthetic parameters (PyTorch-Linear-like uniform init).
    bound1 = 1.0 / (input_dim ** 0.5)
    bound2 = 1.0 / (hidden ** 0.5)
    w1 = jax.random.uniform(k1, (input_dim, hidden), jnp.float32, -bound1, bound1)
    b1 = jax.random.uniform(k2, (hidden,), jnp.float32, -bound1, bound1)
    w2 = jax.random.uniform(k3, (hidden, output_dim), jnp.float32, -bound2, bound2)
    b2 = jax.random.uniform(k4, (output_dim,), jnp.float32, -bound2, bound2)

    params = prepare_classifier_params(w1, b1, w2, b2)   # one-time weight prep

    ok = True
    # (batch, block_batch): default single tile, non-multiple-of-16 batch
    # (exercises pad), and a forced small tile producing a multi-tile ragged
    # grid (B_pad=48, TB=32 -> grid=2 with a masked last block).
    for batch, bb in ((16, 4096), (13, 4096), (40, 32)):
        x = jax.random.normal(kx, (batch, input_dim), dtype=jnp.float32)

        out = classifier_forward(x, params, block_batch=bb)
        out = jax.block_until_ready(out)
        assert out.shape == (batch, output_dim)

        ref_bf16 = _ref_matched(x, w1, b1, w2, b2)
        ref_full = _ref_f32(x, w1, b1, w2, b2)
        ok &= bool(jnp.allclose(out, ref_bf16, atol=2e-5, rtol=2e-5))
        ok &= bool(jnp.allclose(out, ref_full, atol=3e-2, rtol=3e-2))

    assert ok, "mismatch vs JAX reference"
    print("KERNEL_OK")
</pallas_src>

<mosaic_0001>
module attributes {stable_mosaic.version = 11 : i64} {
  func.func @_classifier_kernel(%arg0: i32, %arg1: memref<16x256xf32, #tpu.memory_space<vmem>>, %arg2: memref<256x128xbf16, #tpu.memory_space<vmem>>, %arg3: memref<1x128xf32, #tpu.memory_space<vmem>>, %arg4: memref<128x256xbf16, #tpu.memory_space<vmem>>, %arg5: memref<1x256xf32, #tpu.memory_space<vmem>>, %arg6: memref<16x256xf32, #tpu.memory_space<vmem>>) attributes {dimension_semantics = [#tpu.dimension_semantics<parallel>], iteration_bounds = array<i64: 1>, scalar_prefetch = 0 : i64, scratch_operands = 0 : i64, tpu.core_type = #tpu.core_type<tc>, window_params = [{transform_indices = @transform_0, window_bounds = array<i64: 16, 256>}, {pipeline_mode = #tpu.pipeline_mode<synchronous>, transform_indices = @transform_1, window_bounds = array<i64: 256, 128>}, {pipeline_mode = #tpu.pipeline_mode<synchronous>, transform_indices = @transform_2, window_bounds = array<i64: 1, 128>}, {pipeline_mode = #tpu.pipeline_mode<synchronous>, transform_indices = @transform_3, window_bounds = array<i64: 128, 256>}, {pipeline_mode = #tpu.pipeline_mode<synchronous>, transform_indices = @transform_4, window_bounds = array<i64: 1, 256>}, {transform_indices = @transform_5, window_bounds = array<i64: 16, 256>}]} {
    %c0 = arith.constant 0 : index
    %c0_0 = arith.constant 0 : index
    %0 = vector.load %arg1[%c0, %c0_0] : memref<16x256xf32, #tpu.memory_space<vmem>>, vector<16x256xf32>
    %1 = arith.truncf %0 : vector<16x256xf32> to vector<16x256xbf16>
    %c0_1 = arith.constant 0 : index
    %c0_2 = arith.constant 0 : index
    %2 = vector.load %arg2[%c0_1, %c0_2] : memref<256x128xbf16, #tpu.memory_space<vmem>>, vector<256x128xbf16>
    %cst = arith.constant dense<0.000000e+00> : vector<16x128xf32>
    %3 = tpu.matmul %1, %2, %cst {dimension_numbers = #tpu.dot_dimension_numbers<[1], [0], [0], [1], [0, 0, 1, 1], [], []>} : vector<16x256xbf16>, vector<256x128xbf16>, vector<16x128xf32> -> vector<16x128xf32>
    %c0_3 = arith.constant 0 : index
    %c0_4 = arith.constant 0 : index
    %4 = vector.load %arg3[%c0_3, %c0_4] : memref<1x128xf32, #tpu.memory_space<vmem>>, vector<1x128xf32>
    %5 = vector.broadcast %4 : vector<1x128xf32> to vector<16x128xf32>
    %6 = arith.addf %3, %5 : vector<16x128xf32>
    %cst_5 = arith.constant 0.000000e+00 : f32
    %7 = vector.broadcast %cst_5 : f32 to vector<16x128xf32>
    %8 = arith.maximumf %6, %7 : vector<16x128xf32>
    %9 = arith.truncf %8 : vector<16x128xf32> to vector<16x128xbf16>
    %c0_6 = arith.constant 0 : index
    %c0_7 = arith.constant 0 : index
    %10 = vector.load %arg4[%c0_6, %c0_7] : memref<128x256xbf16, #tpu.memory_space<vmem>>, vector<128x256xbf16>
    %cst_8 = arith.constant dense<0.000000e+00> : vector<16x256xf32>
    %11 = tpu.matmul %9, %10, %cst_8 {dimension_numbers = #tpu.dot_dimension_numbers<[1], [0], [0], [1], [0, 0, 1, 1], [], []>} : vector<16x128xbf16>, vector<128x256xbf16>, vector<16x256xf32> -> vector<16x256xf32>
    %c0_9 = arith.constant 0 : index
    %c0_10 = arith.constant 0 : index
    %12 = vector.load %arg5[%c0_9, %c0_10] : memref<1x256xf32, #tpu.memory_space<vmem>>, vector<1x256xf32>
    %13 = vector.broadcast %12 : vector<1x256xf32> to vector<16x256xf32>
    %14 = arith.addf %11, %13 : vector<16x256xf32>
    %15 = arith.negf %14 : vector<16x256xf32>
    %16 = math.exp %15 : vector<16x256xf32>
    %cst_11 = arith.constant 1.000000e+00 : f32
    %17 = vector.broadcast %cst_11 : f32 to vector<16x256xf32>
    %18 = arith.addf %17, %16 : vector<16x256xf32>
    %19 = arith.divf %17, %18 : vector<16x256xf32>
    %c0_12 = arith.constant 0 : index
    %c0_13 = arith.constant 0 : index
    %20 = vector.load %arg6[%c0_12, %c0_13] : memref<16x256xf32, #tpu.memory_space<vmem>>, vector<16x256xf32>
    tpu.vector_store %arg6[%c0_12, %c0_13], %19 {strides = array<i32>} : memref<16x256xf32, #tpu.memory_space<vmem>>, vector<16x256xf32>,
    return
  }
  func.func @transform_0(%arg0: i32) -> (i32, i32) {
    %c0_i32 = arith.constant 0 : i32
    %c0_i32_0 = arith.constant 0 : i32
    return %arg0, %c0_i32 : i32, i32
  }
  func.func @transform_1(%arg0: i32) -> (i32, i32) {
    %c0_i32 = arith.constant 0 : i32
    %c0_i32_0 = arith.constant 0 : i32
    %c0_i32_1 = arith.constant 0 : i32
    return %c0_i32, %c0_i32_0 : i32, i32
  }
  func.func @transform_2(%arg0: i32) -> (i32, i32) {
    %c0_i32 = arith.constant 0 : i32
    %c0_i32_0 = arith.constant 0 : i32
    %c0_i32_1 = arith.constant 0 : i32
    return %c0_i32, %c0_i32_0 : i32, i32
  }
  func.func @transform_3(%arg0: i32) -> (i32, i32) {
    %c0_i32 = arith.constant 0 : i32
    %c0_i32_0 = arith.constant 0 : i32
    %c0_i32_1 = arith.constant 0 : i32
    return %c0_i32, %c0_i32_0 : i32, i32
  }
  func.func @transform_4(%arg0: i32) -> (i32, i32) {
    %c0_i32 = arith.constant 0 : i32
    %c0_i32_0 = arith.constant 0 : i32
    %c0_i32_1 = arith.constant 0 : i32
    return %c0_i32, %c0_i32_0 : i32, i32
  }
  func.func @transform_5(%arg0: i32) -> (i32, i32) {
    %c0_i32 = arith.constant 0 : i32
    %c0_i32_0 = arith.constant 0 : i32
    return %arg0, %c0_i32 : i32, i32
  }
}

</mosaic_0001>

<bundles_post_ra>
// kernel: tpu_custom_call.1
= control target key start
LH: loop header
LB: loop body
LE: loop exit
PB: predicated region body
PF: predicated region fallthrough
CT: control target
= control target key end

     0   :  { %10 = vsyncpa [#allocation3], 0  ;;  %s766_s0 = inlined_call_operand.hbm [shape: f32[16,256], index: 0, kind: input, shape index: {}]   ;;  %s767_s1 = inlined_call_operand.hbm [shape: bf16[256,128], index: 1, kind: input, shape index: {}]   ;;  %s768_s2 = inlined_call_operand.vmem [shape: f32[1,128], index: 2, kind: input, shape index: {}]   ;;  %s769_s3 = inlined_call_operand.hbm [shape: bf16[128,256], index: 3, kind: input, shape index: {}]   ;;  %s770_s4 = inlined_call_operand.vmem [shape: f32[1,256], index: 4, kind: input, shape index: {}]   ;;  %s771_s5 = inlined_call_operand.hbm [shape: f32[16,256], index: 5, kind: output, shape index: {}]  }
   0x1   :  { %11 = vsyncpa [#allocation6], 0 }
   0x2   :  { %12 = vsyncpa [#allocation4], 0  ;;  %s665_s18 = smov [#allocation5]   ;;  %s571_s22 = scalar_lea.hbm %s767_s1, 2048 }
   0x3   :  { %s30_s19 = sshll.u32 %s665_s18, 4  ;;  %p572_p0 = scmp.ne.s32.totalorder %s767_s1, %s571_s22  ;;  %s31_s19 = int_to_ptr.vmem [resolvable:$true] %s30_s19 }
   0x4   :  { %p575_p1 = scmp.lt.u32.totalorder %s571_s22, %s767_s1 }
   0x6   :  { %p577_p2 = pnand %p575_p1, %p572_p0 }
   0x8   :  { %580 = shalt.err (!%p577_p2)
}
   0x9   :  { %s581_s27 = scalar_lea.vmem %s31_s19, 2048  ;;  %p586_p4 = scmp.lt.s32.totalorder %s31_s19, %s31_s19 }
   0xa   :  { %p582_p3 = scmp.ne.s32.totalorder %s31_s19, %s581_s27  ;;  %p587_p5 = scmp.lt.s32.totalorder %s581_s27, %s581_s27 }
   0xc   :  { %p588_p6 = por %p587_p5, %p586_p4 }
   0xe   :  { %p589_p7 = pnand %p588_p6, %p582_p3 }
  0x10   :  { %592 = shalt.err (!%p589_p7)
}
  0x11   :  { %s666_s28 = smov 64   ;;  %s667_s29 = smov 4  }
  0x12   :  { %36 = dma.hbm_to_vmem [thread:$0]  %s767_s1, 2048, %s31_s19, [#allocation6], %s666_s28, %s666_s28, %s667_s29  }
  0x13   :  { %s668_s7 = smov [#allocation2]   ;;  %s593_s11 = scalar_lea.hbm %s766_s0, 512 }
  0x14   :  { %s18_s8 = sshll.u32 %s668_s7, 4  ;;  %p594_p8 = scmp.ne.s32.totalorder %s766_s0, %s593_s11  ;;  %s19_s8 = int_to_ptr.vmem [resolvable:$true] %s18_s8 }
  0x15   :  { %p597_p9 = scmp.lt.u32.totalorder %s593_s11, %s766_s0 }
  0x17   :  { %p599_p10 = pnand %p597_p9, %p594_p8 }
  0x19   :  { %602 = shalt.err (!%p599_p10)
}
  0x1a   :  { %s603_s16 = scalar_lea.vmem %s19_s8, 512  ;;  %p608_p12 = scmp.lt.s32.totalorder %s19_s8, %s19_s8 }
  0x1b   :  { %p604_p11 = scmp.ne.s32.totalorder %s19_s8, %s603_s16  ;;  %p609_p13 = scmp.lt.s32.totalorder %s603_s16, %s603_s16 }
  0x1d   :  { %p610_p0 = por %p609_p13, %p608_p12 }
  0x1f   :  { %p611_p1 = pnand %p610_p0, %p604_p11 }
  0x21   :  { %614 = shalt.err (!%p611_p1)
}
  0x22   :  { %s669_s1 = smov 256   ;;  %s670_s17 = smov 16  }
  0x23   :  { %24 = dma.hbm_to_vmem [thread:$0]  %s766_s0, 512, %s19_s8, [#allocation3], %s669_s1, %s669_s1, %s670_s17  }
  0x24   :  { %s671_s20 = smov [#allocation7]   ;;  %s615_s24 = scalar_lea.hbm %s769_s3, 2048 }
  0x25   :  { %s44_s21 = sshll.u32 %s671_s20, 4  ;;  %p616_p2 = scmp.ne.s32.totalorder %s769_s3, %s615_s24  ;;  %s45_s21 = int_to_ptr.vmem [resolvable:$true] %s44_s21 }
  0x26   :  { %p619_p3 = scmp.lt.u32.totalorder %s615_s24, %s769_s3 }
  0x28   :  { %p621_p4 = pnand %p619_p3, %p616_p2 }
  0x2a   :  { %624 = shalt.err (!%p621_p4)
}
  0x2b   :  { %s625_s29 = scalar_lea.vmem %s45_s21, 2048  ;;  %p630_p6 = scmp.lt.s32.totalorder %s45_s21, %s45_s21 }
  0x2c   :  { %p626_p5 = scmp.ne.s32.totalorder %s45_s21, %s625_s29  ;;  %p631_p7 = scmp.lt.s32.totalorder %s625_s29, %s625_s29 }
  0x2e   :  { %p632_p8 = por %p631_p7, %p630_p6 }
  0x30   :  { %p633_p9 = pnand %p632_p8, %p626_p5 }
  0x32   :  { %636 = shalt.err (!%p633_p9)
}
  0x33   :  { %s672_s0 = smov 128   ;;  %s673_s30 = smov 8  }
  0x34   :  { %50 = dma.hbm_to_vmem [thread:$0]  %s769_s3, 2048, %s45_s21, [#allocation6], %s672_s0, %s672_s0, %s673_s30  }
  0x35   :  { %659 = dma.done.wait [#allocation3], 512  }
  0x36   :  { %660 = vsyncadd [#allocation3], 4294966784 }
  0x37   :  { %661 = dma.done.wait [#allocation6], 4096  }
  0x38   :  { %662 = vsyncadd [#allocation6], 4294963200  ;;  %v515_v0 = vld [vmem:[#allocation5 + $0x40] sm:$0xff]   ;;  %v517_v2 = vld [vmem:[#allocation5 + $0x48] sm:$0xff]   ;;  %v674_v38 = vmov 0   ;;  %v266_v51 = vlaneseq }
  0x39   :  { %v516_v1 = vld [vmem:[#allocation5] sm:$0xff]   ;;  %482 = vmatprep.subr.bf16.mxu0 %v515_v0  ;;  %v518_v3 = vld [vmem:[#allocation5 + $0x8] sm:$0xff]   ;;  %v519_v4 = vld [vmem:[#allocation5 + $0x50] sm:$0xff]   ;;  %388 = vmatprep.mubr.bf16.mxu1 %v674_v38 }
  0x3a   :  { %483 = vmatpush3.bf16.msra.mxu0 %v516_v1  ;;  %v520_v5 = vld [vmem:[#allocation5 + $0x10] sm:$0xff]   ;;  %v521_v6 = vld [vmem:[#allocation5 + $0x58] sm:$0xff]   ;;  %v523_v8 = vld [vmem:[#allocation5 + $0x60] sm:$0xff]   ;;  %v267_v52 = vshrl.u32 %v266_v51, 7 }
  0x3b   :  { %484 = vmatprep.subr.bf16.mxu0 %v517_v2  ;;  %v522_v7 = vld [vmem:[#allocation5 + $0x18] sm:$0xff]   ;;  %v524_v9 = vld [vmem:[#allocation5 + $0x20] sm:$0xff]   ;;  %v525_v10 = vld [vmem:[#allocation5 + $0x68] sm:$0xff]  }
  0x3c   :  { %v64_v11 = vld [vmem:[#allocation2 + $0x8] sm:$0xff]  ;;  %v66_v12 = vld [vmem:[#allocation2 + $0x18] sm:$0xff]  ;;  %v527_v18 = vld [vmem:[#allocation5 + $0x70] sm:$0xff]   ;;  %v268_v53 = vsub.s32 0, %v267_v52  ;;  %v272_v55 = vsub.s32 1, %v267_v52 }
  0x3d   :  { %v68_v13 = vpack.c.bf16 %v66_v12, %v64_v11  ;;  %v531_v14 = vld [vmem:[#allocation7 + $0x4] ss:$8 sps:$4 sm:$0xff]   ;;  %v533_v15 = vld [vmem:[#allocation7] ss:$8 sps:$4 sm:$0xff]   ;;  %v534_v17 = vld [vmem:[#allocation7 + $0x14] ss:$8 sps:$4 sm:$0xff]  }
  0x3e   :  { %485 = vmatpush3.bf16.msra.mxu0 %v518_v3  ;;  %v526_v16 = vld [vmem:[#allocation5 + $0x28] sm:$0xff]   ;;  %356 = vmatprep.subr.bf16.mxu1 %v531_v14  ;;  %v536_v19 = vld [vmem:[#allocation7 + $0x10] ss:$8 sps:$4 sm:$0xff]   ;;  %v540_v24 = vld [vmem:[#allocation7 + $0x34] ss:$8 sps:$4 sm:$0xff]  }
  0x3f   :  { %486 = vmatprep.subr.bf16.mxu0 %v519_v4  ;;  %236 = vmatprep.mubr.bf16.mxu0 %v68_v13  ;;  %v528_v20 = vld [vmem:[#allocation5 + $0x30] sm:$0xff]   ;;  %v537_v21 = vld [vmem:[#allocation7 + $0x24] ss:$8 sps:$4 sm:$0xff]   ;;  %v529_v22 = vld [vmem:[#allocation5 + $0x78] sm:$0xff]  }
  0x40   :  { %357 = vmatpush1.bf16.msra.mxu1 %v533_v15  ;;  %v539_v23 = vld [vmem:[#allocation7 + $0x20] ss:$8 sps:$4 sm:$0xff]   ;;  %v530_v25 = vld [vmem:[#allocation5 + $0x38] sm:$0xff]   ;;  %v65_v27 = vld [vmem:[#allocation2 + $0x10] sm:$0xff] }
  0x41   :  { %358 = vmatprep.subr.bf16.mxu1 %v534_v17  ;;  %v63_v26 = vld [vmem:[#allocation2] sm:$0xff]  ;;  %v542_v28 = vld [vmem:[#allocation7 + $0x30] ss:$8 sps:$4 sm:$0xff]   ;;  %v546_v32 = vld [vmem:[#allocation7 + $0x54] ss:$8 sps:$4 sm:$0xff]  }
  0x42   :  { %487 = vmatpush3.bf16.msra.mxu0 %v520_v5  ;;  %v67_v29 = vpack.c.bf16 %v65_v27, %v63_v26  ;;  %v543_v30 = vld [vmem:[#allocation7 + $0x44] ss:$8 sps:$4 sm:$0xff]   ;;  %v545_v31 = vld [vmem:[#allocation7 + $0x40] ss:$8 sps:$4 sm:$0xff]   ;;  %v548_v33 = vld [vmem:[#allocation7 + $0x50] ss:$8 sps:$4 sm:$0xff]  }
  0x43   :  { %488 = vmatprep.subr.bf16.mxu0 %v521_v6  ;;  %v549_v34 = vld [vmem:[#allocation7 + $0x64] ss:$8 sps:$4 sm:$0xff]   ;;  %v551_v35 = vld [vmem:[#allocation7 + $0x60] ss:$8 sps:$4 sm:$0xff]   ;;  %v552_v36 = vld [vmem:[#allocation7 + $0x74] ss:$8 sps:$4 sm:$0xff]  }
  0x44   :  { %359 = vmatpush1.bf16.msra.mxu1 %v536_v19  ;;  %v554_v37 = vld [vmem:[#allocation7 + $0x70] ss:$8 sps:$4 sm:$0xff]   ;;  %v445_v40 = vld [vmem:[%s768_s2] ss:$0 sm:$0xff]  ;;  %s675_s2 = smov [#allocation8]  }
  0x45   :  { %360 = vmatprep.subr.bf16.mxu1 %v537_v21  ;;  %v264_v54 = vld [vmem:[%s770_s4] sm:$0x3]  ;;  %s432_s4 = sshll.u32 %s675_s2, 4  ;;  %s433_s4 = int_to_ptr.vmem [resolvable:$true] %s432_s4 }
  0x46   :  { %489 = vmatpush3.bf16.msra.mxu0 %v522_v7  ;;  %v269_v56 = vrot.slane %v264_v54, %v268_v53  ;;  %v273_v57 = vrot.slane %v264_v54, %v272_v55  ;;  %s637_s11 = scalar_lea.vmem %s433_s4, 512  ;;  %p642_p11 = scmp.lt.s32.totalorder %s433_s4, %s433_s4 }
  0x47   :  { %490 = vmatprep.subr.bf16.mxu0 %v523_v8  ;;  %p638_p10 = scmp.ne.s32.totalorder %s433_s4, %s637_s11  ;;  %p643_p12 = scmp.lt.s32.totalorder %s637_s11, %s637_s11 }
  0x48   :  { %361 = vmatpush1.bf16.msra.mxu1 %v539_v23 }
  0x49   :  { %362 = vmatprep.subr.bf16.mxu1 %v540_v24  ;;  %p644_p13 = por %p643_p12, %p642_p11 }
  0x4a   :  { %491 = vmatpush3.bf16.msra.mxu0 %v524_v9 }
  0x4b   :  { %492 = vmatprep.subr.bf16.mxu0 %v525_v10  ;;  %p645_p0 = pnand %p644_p13, %p638_p10 }
  0x4c   :  { %363 = vmatpush1.bf16.msra.mxu1 %v542_v28 }
  0x4d   :  { %364 = vmatprep.subr.bf16.mxu1 %v543_v30 }
  0x4e   :  { %493 = vmatpush3.bf16.msra.mxu0 %v526_v16 }
  0x4f   :  { %494 = vmatprep.subr.bf16.mxu0 %v527_v18 }
  0x50   :  { %365 = vmatpush1.bf16.msra.mxu1 %v545_v31 }
  0x51   :  { %366 = vmatprep.subr.bf16.mxu1 %v546_v32 }
  0x52   :  { %495 = vmatpush3.bf16.msra.mxu0 %v528_v20 }
  0x53   :  { %496 = vmatprep.subr.bf16.mxu0 %v529_v22 }
  0x54   :  { %367 = vmatpush1.bf16.msra.mxu1 %v548_v33 }
  0x55   :  { %368 = vmatprep.subr.bf16.mxu1 %v549_v34 }
  0x56   :  { %497 = vmatpush3.bf16.msra.mxu0 %v530_v25 }
  0x58   :  { %369 = vmatpush1.bf16.msra.mxu1 %v551_v35 }
  0x59   :  { %237 = vmatmul.mubr.bf16.vlgmr.msra.gmra.mrb[0].mxu0 %v67_v29  ;;  %370 = vmatprep.subr.bf16.mxu1 %v552_v36 }
  0x5c   :  { %371 = vmatpush1.bf16.msra.mxu1 %v554_v37 }
 0x12c   :  { %v498_v39 = vpop.f32.mrb[0].mxu0 }
 0x12d   :  { %v499_v41 = vpop.f32.mrb[1].mxu0 }
 0x12e   :  { %v500_v42 = vadd.f32 %v499_v41, %v498_v39  ;;  %v501_v43 = vpop.f32.mrb[2].mxu0 }
 0x12f   :  { %v502_v44 = vpop.f32.mrb[3].mxu0 }
 0x130   :  { %v239_v45 = vadd.f32 %v500_v42, %v445_v40  ;;  %v503_v46 = vadd.f32 %v502_v44, %v501_v43 }
 0x132   :  { %v242_v47 = vadd.f32 %v503_v46, %v445_v40  ;;  %v245_v48 = vmax.f32 %v239_v45, 0.0 }
 0x134   :  { %v246_v49 = vmax.f32 %v242_v47, 0.0 }
 0x136   :  { %v247_v50 = vpack.c.bf16 %v246_v49, %v245_v48 }
 0x138   :  { %389 = vmatmul.mubr.bf16.vlgmr.msra.gmra.mrb[0].mxu1 %v247_v50 }
 0x20b   :  { %v390_v58 = vpop.f32.mrb[0].mxu1 }
 0x20c   :  { %v391_v59 = vadd.f32 %v390_v58, %v269_v56  ;;  %v392_v60 = vpop.f32.mrb[1].mxu1 }
 0x20d   :  { %v393_v61 = vadd.f32 %v392_v60, %v273_v57  ;;  %v394_v62 = vpop.f32.mrb[2].mxu1 }
 0x20e   :  { %v478_v63 = vmul.f32 -1.442695, %v391_v59  ;;  %v395_v0 = vadd.f32 %v394_v62, %v269_v56  ;;  %v396_v1 = vpop.f32.mrb[3].mxu1 }
 0x20f   :  { %v479_v2 = vmul.f32 -1.442695, %v393_v61  ;;  %v397_v3 = vadd.f32 %v396_v1, %v273_v57 }
 0x210   :  { %555 = vpow2.f32 %v478_v63  ;;  %v480_v4 = vmul.f32 -1.442695, %v395_v0 }
 0x211   :  { %557 = vpow2.f32 %v479_v2  ;;  %v481_v5 = vmul.f32 -1.442695, %v397_v3 }
 0x212   :  { %559 = vpow2.f32 %v480_v4 }
 0x213   :  { %561 = vpow2.f32 %v481_v5 }
 0x21a   :  { %v556_v6 = vpop.eup %555 }
 0x21b   :  { %v558_v7 = vpop.eup %557  ;;  %v411_v8 = vadd.f32 1.0, %v556_v6 }
 0x21c   :  { %v560_v9 = vpop.eup %559  ;;  %v412_v10 = vadd.f32 1.0, %v558_v7 }
 0x21d   :  { %v562_v11 = vpop.eup %561  ;;  %563 = vrcp.f32 %v411_v8  ;;  %v413_v12 = vadd.f32 1.0, %v560_v9 }
 0x21e   :  { %565 = vrcp.f32 %v412_v10  ;;  %v414_v13 = vadd.f32 1.0, %v562_v11 }
 0x21f   :  { %567 = vrcp.f32 %v413_v12 }
 0x220   :  { %569 = vrcp.f32 %v414_v13 }
 0x227   :  { %v564_v14 = vpop.eup %563 }
 0x228   :  { %v566_v15 = vpop.eup %565  ;;  %423 = vst [vmem:[#allocation8] sm:$0xff] %v564_v14 }
 0x229   :  { %v568_v16 = vpop.eup %567  ;;  %424 = vst [vmem:[#allocation8 + $0x8] sm:$0xff] %v566_v15 }
 0x22a   :  { %v570_v17 = vpop.eup %569  ;;  %425 = vst [vmem:[#allocation8 + $0x10] sm:$0xff] %v568_v16 }
 0x22b   :  { %426 = vst [vmem:[#allocation8 + $0x18] sm:$0xff] %v570_v17 }
 0x22c   :  { %648 = shalt.err (!%p645_p0)
}
 0x22d   :  { %s649_s14 = scalar_lea.hbm %s771_s5, 512 }
 0x22e   :  { %p650_p1 = scmp.ne.s32.totalorder %s771_s5, %s649_s14  ;;  %p653_p2 = scmp.lt.u32.totalorder %s649_s14, %s771_s5 }
 0x230   :  { %p655_p3 = pnand %p653_p2, %p650_p1 }
 0x232   :  { %658 = shalt.err (!%p655_p3)
}
 0x233   :  { %438 = dma.vmem_to_hbm [thread:$0]  %s433_s4, 512, %s771_s5, [#allocation4], %s669_s1, %s669_s1, %s670_s17  }
 0x234   :  { %663 = dma.done.wait [#allocation4], 512  }
 0x235   :  { %664 = vsyncadd [#allocation4], 4294966784 }
 0x236   :  { %442 = vsyncpa [#allocation3], 1 }
 0x237   :  { %443 = vsyncpa [#allocation6], 1 }
 0x238   :  { %444 = vsyncpa [#allocation4], 1 }

</bundles_post_ra>
